<compile_context>
chip_gen: v7x
topology: tpu7x:2x2x1
jax: 0.10.0
libtpu: 0.0.40
codegen_flags: <defaults>
</compile_context>

<pallas_src>
import jax
import jax.numpy as jnp
from jax.experimental import pallas as pl
from jax.experimental.pallas import tpu as pltpu


def _argmax_kernel_lanes(x_ref, o_ref):
    """x_ref: (1, C, S, 128) native dtype; o_ref: (1, S, 128) int32.

    Single pass over channels carrying a running (max, argmax) pair.  Strict
    '>' gives first-occurrence tie-breaking (matches jnp.argmax / torch CPU).
    """
    c = x_ref.shape[1]
    best_val = x_ref[0, 0]                                  # (S, 128)
    best_idx = jnp.zeros(best_val.shape, jnp.int32)
    for ci in range(1, c):                                  # static, unrolled
        xc = x_ref[0, ci]                                   # per-channel load
        take = xc > best_val
        best_val = jnp.where(take, xc, best_val)
        best_idx = jnp.where(take, jnp.int32(ci), best_idx)
    o_ref[0] = best_idx


def _argmax_kernel_flat(x_ref, o_ref):
    """Fallback layout (HW % 128 != 0): x_ref (1, C, THW); o_ref (1, THW) int32."""
    c = x_ref.shape[1]
    best_val = x_ref[0, 0:1, :]                             # (1, THW)
    best_idx = jnp.zeros(best_val.shape, jnp.int32)
    for ci in range(1, c):
        xc = x_ref[0, ci:ci + 1, :]
        take = xc > best_val
        best_val = jnp.where(take, xc, best_val)
        best_idx = jnp.where(take, jnp.int32(ci), best_idx)
    o_ref[...] = best_idx


def out_softmax(x, block_bytes=8 << 20):
    """OutSoftmax forward: argmax(softmax2d(x), dim=1) -> (N, H, W) int32."""
    n, c, h, w = x.shape
    hw = h * w
    dsize = jnp.dtype(x.dtype).itemsize

    # Spatial tile (elements): ~block_bytes of input per grid step, lane (128)
    # aligned.  Worst case (C=4, f32): 2x8MiB input + 2x2MiB out + ~6MiB temps
    # = ~26 MiB, under the 32 MiB scoped limit requested below.
    thw = max(128, (block_bytes // (c * dsize)) // 128 * 128)

    cost = pl.CostEstimate(
        flops=3 * n * c * hw,
        transcendentals=0,
        bytes_accessed=n * c * hw * dsize + n * hw * 4,
    )
    cparams = pltpu.CompilerParams(
        dimension_semantics=("parallel", "parallel"),
        vmem_limit_bytes=32 << 20,
    )

    if hw % 128 == 0:
        # Lane/sublane-dense layout: (N, C, S, 128) — free reshape (contiguous).
        s_total = hw // 128
        s_blk = thw // 128
        if s_blk >= s_total:
            s_blk = s_total                      # full extent: always legal
        else:
            s_blk = max(8, (s_blk // 8) * 8)     # sublane (8) aligned tile
            s_blk = min(s_blk, s_total)
        x4 = x.reshape(n, c, s_total, 128)
        grid = (n, pl.cdiv(s_total, s_blk))
        out = pl.pallas_call(
            _argmax_kernel_lanes,
            out_shape=jax.ShapeDtypeStruct((n, s_total, 128), jnp.int32),
            grid_spec=pltpu.PrefetchScalarGridSpec(
                num_scalar_prefetch=0,
                grid=grid,
                in_specs=[pl.BlockSpec((1, c, s_blk, 128),
                                       lambda b, j: (b, 0, j, 0))],
                out_specs=pl.BlockSpec((1, s_blk, 128),
                                       lambda b, j: (b, j, 0)),
            ),
            compiler_params=cparams,
            cost_estimate=cost,
        )(x4)
        return out.reshape(n, h, w)

    # Ragged spatial extent: flat (N, C, HW) layout, no jnp.pad.  The last
    # tile's out-of-bounds lanes are read as garbage and their stores dropped
    # by Pallas boundary handling — fine for a per-lane argmax.
    if thw >= hw:
        thw = hw                                  # single full-extent tile
    x3 = x.reshape(n, c, hw)
    grid = (n, pl.cdiv(hw, thw))
    out = pl.pallas_call(
        _argmax_kernel_flat,
        out_shape=jax.ShapeDtypeStruct((n, hw), jnp.int32),
        grid_spec=pltpu.PrefetchScalarGridSpec(
            num_scalar_prefetch=0,
            grid=grid,
            in_specs=[pl.BlockSpec((1, c, thw), lambda b, j: (b, 0, j))],
            out_specs=pl.BlockSpec((1, thw), lambda b, j: (b, j)),
        ),
        compiler_params=cparams,
        cost_estimate=cost,
    )(x3)
    return out.reshape(n, h, w)


if __name__ == "__main__":
    key = jax.random.PRNGKey(0)
    N, C, H, W = 2, 4, 16, 16
    x = jax.random.normal(key, (N, C, H, W), dtype=jnp.float32)

    y = out_softmax(x)
    jax.block_until_ready(y)

    # Sanity check against plain-JAX reference (softmax is monotone -> same argmax).
    ref = jnp.argmax(jax.nn.softmax(x, axis=1), axis=1).astype(jnp.int32)
    assert y.shape == (N, H, W)
    assert bool(jnp.all(y == ref))

    print("KERNEL_OK")
</pallas_src>

<mosaic_0001>
module attributes {stable_mosaic.version = 11 : i64} {
  func.func @_argmax_kernel_lanes(%arg0: i32, %arg1: i32, %arg2: memref<1x4x2x128xf32, #tpu.memory_space<vmem>>, %arg3: memref<1x2x128xi32, #tpu.memory_space<vmem>>) attributes {dimension_semantics = [#tpu.dimension_semantics<parallel>, #tpu.dimension_semantics<parallel>], iteration_bounds = array<i64: 2, 1>, scalar_prefetch = 0 : i64, scratch_operands = 0 : i64, tpu.core_type = #tpu.core_type<tc>, window_params = [{transform_indices = @transform_0, window_bounds = array<i64: 1, 4, 2, 128>}, {transform_indices = @transform_1, window_bounds = array<i64: 1, 2, 128>}]} {
    %c0 = arith.constant 0 : index
    %c0_0 = arith.constant 0 : index
    %c0_1 = arith.constant 0 : index
    %c0_2 = arith.constant 0 : index
    %0 = vector.load %arg2[%c0, %c0_0, %c0_1, %c0_2] : memref<1x4x2x128xf32, #tpu.memory_space<vmem>>, vector<1x1x2x128xf32>
    %1 = vector.shape_cast %0 : vector<1x1x2x128xf32> to vector<2x128xf32>
    %c0_i32 = arith.constant 0 : i32
    %2 = vector.broadcast %c0_i32 : i32 to vector<2x128xi32>
    %c0_3 = arith.constant 0 : index
    %c1 = arith.constant 1 : index
    %c0_4 = arith.constant 0 : index
    %c0_5 = arith.constant 0 : index
    %3 = vector.load %arg2[%c0_3, %c1, %c0_4, %c0_5] : memref<1x4x2x128xf32, #tpu.memory_space<vmem>>, vector<1x1x2x128xf32>
    %4 = vector.shape_cast %3 : vector<1x1x2x128xf32> to vector<2x128xf32>
    %5 = arith.cmpf ogt, %4, %1 : vector<2x128xf32>
    %6 = arith.select %5, %4, %1 : vector<2x128xi1>, vector<2x128xf32>
    %c1_i32 = arith.constant 1 : i32
    %7 = vector.broadcast %c1_i32 : i32 to vector<2x128xi32>
    %8 = arith.select %5, %7, %2 : vector<2x128xi1>, vector<2x128xi32>
    %c0_6 = arith.constant 0 : index
    %c2 = arith.constant 2 : index
    %c0_7 = arith.constant 0 : index
    %c0_8 = arith.constant 0 : index
    %9 = vector.load %arg2[%c0_6, %c2, %c0_7, %c0_8] : memref<1x4x2x128xf32, #tpu.memory_space<vmem>>, vector<1x1x2x128xf32>
    %10 = vector.shape_cast %9 : vector<1x1x2x128xf32> to vector<2x128xf32>
    %11 = arith.cmpf ogt, %10, %6 : vector<2x128xf32>
    %12 = arith.select %11, %10, %6 : vector<2x128xi1>, vector<2x128xf32>
    %c2_i32 = arith.constant 2 : i32
    %13 = vector.broadcast %c2_i32 : i32 to vector<2x128xi32>
    %14 = arith.select %11, %13, %8 : vector<2x128xi1>, vector<2x128xi32>
    %c0_9 = arith.constant 0 : index
    %c3 = arith.constant 3 : index
    %c0_10 = arith.constant 0 : index
    %c0_11 = arith.constant 0 : index
    %15 = vector.load %arg2[%c0_9, %c3, %c0_10, %c0_11] : memref<1x4x2x128xf32, #tpu.memory_space<vmem>>, vector<1x1x2x128xf32>
    %16 = vector.shape_cast %15 : vector<1x1x2x128xf32> to vector<2x128xf32>
    %17 = arith.cmpf ogt, %16, %12 : vector<2x128xf32>
    %c3_i32 = arith.constant 3 : i32
    %18 = vector.broadcast %c3_i32 : i32 to vector<2x128xi32>
    %19 = arith.select %17, %18, %14 : vector<2x128xi1>, vector<2x128xi32>
    %c0_12 = arith.constant 0 : index
    %c0_13 = arith.constant 0 : index
    %c0_14 = arith.constant 0 : index
    %20 = vector.load %arg3[%c0_12, %c0_13, %c0_14] : memref<1x2x128xi32, #tpu.memory_space<vmem>>, vector<1x2x128xi32>
    %21 = vector.shape_cast %20 : vector<1x2x128xi32> to vector<2x128xi32>
    %22 = vector.shape_cast %19 : vector<2x128xi32> to vector<1x2x128xi32>
    tpu.vector_store %arg3[%c0_12, %c0_13, %c0_14], %22 {strides = array<i32>} : memref<1x2x128xi32, #tpu.memory_space<vmem>>, vector<1x2x128xi32>,
    return
  }
  func.func @transform_0(%arg0: i32, %arg1: i32) -> (i32, i32, i32, i32) {
    %c0_i32 = arith.constant 0 : i32
    %c0_i32_0 = arith.constant 0 : i32
    %c0_i32_1 = arith.constant 0 : i32
    return %arg0, %c0_i32, %arg1, %c0_i32_0 : i32, i32, i32, i32
  }
  func.func @transform_1(%arg0: i32, %arg1: i32) -> (i32, i32, i32) {
    %c0_i32 = arith.constant 0 : i32
    %c0_i32_0 = arith.constant 0 : i32
    return %arg0, %arg1, %c0_i32 : i32, i32, i32
  }
}

</mosaic_0001>

<bundles_post_ra>
// kernel: tpu_custom_call.1
= control target key start
LH: loop header
LB: loop body
LE: loop exit
PB: predicated region body
PF: predicated region fallthrough
CT: control target
= control target key end

     0   :  { %6 = vsyncpa [#allocation3], 0  ;;  %s650_s0 = inlined_call_operand.hbm [shape: f32[2,4,2,128], index: 0, kind: input, shape index: {}]   ;;  %s651_s1 = inlined_call_operand.hbm [shape: s32[2,2,128], index: 1, kind: output, shape index: {}]  }
   0x1   :  { %8 = vsyncpa [#allocation3 + $0x1], 0 }
   0x2   :  { %9 = vsyncpa [#allocation4], 0 }
   0x3   :  { %11 = vsyncpa [#allocation4 + $0x1], 0  ;;  %s476_s6 = smov 0   ;;  %s478_s7 = smov 0  }
   0x4   :  { %s480_s8 = smov 0   ;;  %s482_s9 = smov 0  }
   0x5   :  { %s484_s10 = smov 0   ;;  %s486_s11 = smov 0  }
   0x6 LB: > { %s264_s12 = sadd.s32 4294967295, %s459_s11   ;;  %s265_s13 = sadd.s32 4294967294, %s459_s11   ;;  %s459_s11 = sphi %s486_s11, %s17_s11   ;;  %s455_s10 = sphi %s484_s10, %s666_s10   ;;  %s451_s9 = sphi %s482_s9, %s665_s9   ;;  %s447_s8 = sphi %s480_s8, %s664_s8   ;;  %s443_s7 = sphi %s478_s7, %s663_s7   ;;  %s439_s6 = sphi %s476_s6, %s662_s6  }
   0x7   : > { %s29_s14 = sadd.s32 1, %s455_s10  ;;  %s38_s15 = sadd.s32 1, %s447_s8 }
   0x8   : > { %p31_p0 = scmp.ge.s32.totalorder %s29_s14, 2  ;;  %p45_p1 = scmp.ne.s32.totalorder %s447_s8, %s443_s7 }
   0x9   : > { %p46_p2 = scmp.eq.s32.totalorder %s459_s11, 0  ;;  %p51_p3 = scmp.ne.s32.totalorder %s443_s7, %s439_s6 }
   0xa   : > { %s668_s14 = smov (%p31_p0, %s29_s14), 0  ;;  %p52_p5 = scmp.eq.s32.totalorder %s264_s12, 0 }
   0xb   : > { %p517_p4 = por %p46_p2, %p45_p1  ;;  %s33_s17 = ssub.s32 %s455_s10, %s668_s14 }
   0xc   : > { %p77_p6 = scmp.eq.s32.totalorder %s264_s12, 1  ;;  %p36_p7 = scmp.eq.s32.totalorder %s33_s17, 0 }
   0xd   : > { %p523_p8 = por %p52_p5, %p51_p3  ;;  %p83_p10 = scmp.eq.s32.totalorder %s265_s13, 1 }
   0xe   : > { %p527_p9 = por %p77_p6, %p45_p1  ;;  %p294_p13 = scmp.lt.s32.totalorder %s459_s11, 2 }
   0xf   : > { %s532_s20 = scalar_select %p36_p7, %s447_s8, %s38_s15  }
  0x10   : > { %s655_s19 = scalar_select %p527_p9, 1, 0 }
  0x11   : > { %p534_p11 = por %p83_p10, %p51_p3  ;;  %s103_s22 = sand.u32 1, %s447_s8  }
  0x12   : > { %s268_s23 = sshll.u32 %s103_s22, 3  ;;  %s281_s24 = sshll.u32 %s455_s10, 7 }
  0x13   : > { %s656_s21 = scalar_select %p534_p11, 1, 0 }
  0x14   : > { %s545_s27 = scalar_lea.hbm %s650_s0, %s281_s24  ;;  %s107_s28 = scalar_lea.vmem [#allocation2], %s268_s23 }
  0x15   : > { %s115_s29 = sshll.u32 %s107_s28, 4  ;;  %p551_p0 = pnand %p294_p13, %p517_p4  ;;  %s547_s29 = int_to_ptr.vmem [resolvable:$true] %s115_s29 }
  0x16   : > { %s556_s2 = scalar_lea.sflag [#allocation3], %s103_s22  ;;  %s347_s3 = scalar_lea.hbm %s545_s27, 128 }
  0x17   : > { %p348_p2 = scmp.ne.s32.totalorder %s545_s27, %s347_s3  ;;  %p349_p3 = pneg %p551_p0 }
  0x18   : > { %s352_s12 = scalar_lea.hbm %s650_s0, 256  ;;  %p353_p4 = scmp.lt.u32.totalorder %s545_s27, %s650_s0 }
  0x19   : > { %p350_p5 = pnand %p349_p3, %p348_p2  ;;  %p354_p7 = scmp.lt.u32.totalorder %s352_s12, %s347_s3 }
  0x1a   : > { %p356_p13 = scmp.lt.u32.totalorder %s347_s3, %s545_s27 }
  0x1b   : > { %p351_p6 = pneg %p350_p5  ;;  %p355_p10 = por %p354_p7, %p353_p4 }
  0x1d   : > { %p357_p12 = por %p356_p13, %p355_p10 }
  0x1f   : > { %p358_p1 = pnand %p357_p12, %p351_p6 }
  0x21   : > { %361 = shalt.err (!%p358_p1)
}
  0x22   : > { %s362_s16 = scalar_lea.vmem %s547_s29, 128  ;;  %s461_s17 = smov [#allocation2]  }
  0x23   : > { %p363_p2 = scmp.ne.s32.totalorder %s547_s29, %s362_s16  ;;  %s367_s22 = sshll.u32 %s461_s17, 4  ;;  %s368_s22 = int_to_ptr.vmem [resolvable:$false] %s367_s22 }
  0x24   : > { %s369_s23 = scalar_lea.vmem %s368_s22, 256  ;;  %p370_p9 = scmp.lt.s32.totalorder %s547_s29, %s368_s22 }
  0x25   : > { %p365_p5 = pnand %p363_p2, %p349_p3  ;;  %p371_p4 = scmp.lt.s32.totalorder %s369_s23, %s362_s16 }
  0x27   : > { %p366_p11 = pneg %p365_p5  ;;  %p372_p7 = por %p371_p4, %p370_p9 }
  0x29   : > { %p373_p10 = pnand %p372_p7, %p366_p11 }
  0x2b   : > { %376 = shalt.err (!%p373_p10)
}
  0x2c   : > { %s462_s24 = smov 32   ;;  %s463_s25 = smov 2  }
  0x2d   : > { %289 = dma.hbm_to_vmem [thread:$0]  (!%p551_p0), %s545_s27, 128, %s547_s29, %s556_s2, %s462_s24, %s462_s24, %s463_s25  }
  0x2e   : > { %p123_p12 = scmp.lt.s32.totalorder %s459_s11, 3  ;;  %p658_p1 = scmp.ge.s32.totalorder %s459_s11, 1 }
  0x30   : > { %p124_p3 = pnand %p658_p1, %p123_p12 }
  0x31   : > { %s588_s26 = sand.u32 (!%p124_p3), 1, %s443_s7  }
  0x32   : > { %127 = sbr.rel (%p124_p3) target bundleno = 85 (0x55), region = 24  ;;  %s272_s28 = sshll.u32 (!%p124_p3), %s588_s26, 3 }
  0x33   : > { %s130_s3 = scalar_lea.sflag (!%p124_p3), [#allocation3], %s588_s26  ;;  %s133_s4 = scalar_lea.vmem (!%p124_p3), [#allocation2], %s272_s28 }
  0x39   : > { %430 = dma.done.wait (%p523_p8), %s130_s3, 128  }
  0x3a   : > { %432 = vsyncadd (%p523_p8), %s130_s3, 4294967168  ;;  %s273_s27 = sshll.u32 %s588_s26, 1  ;;  %v152_v0 = vld [vmem:[%s133_s4] sm:$0x3]  ;;  %v274_v1 = vld [vmem:[%s133_s4 + $0x2] sm:$0x3] }
  0x3b   : > { %v275_v2 = vld [vmem:[%s133_s4 + $0x4] sm:$0x3]  ;;  %vm155_vm0 = vcmp.gt.f32.partialorder %v274_v1, %v152_v0  ;;  %v464_v4 = vmov 0   ;;  %v276_v6 = vld [vmem:[%s133_s4 + $0x6] sm:$0x3]  ;;  %s151_s29 = scalar_lea.vmem [#allocation5], %s273_s27 }
  0x3c   : > { %v156_v3 = vsel %vm155_vm0, %v274_v1, %v152_v0  ;;  %v157_v5 = vsel %vm155_vm0, 1, %v464_v4  ;;  %s183_s30 = sshll.u32 %s151_s29, 4  ;;  %s278_s2 = sshll.u32 %s451_s9, 5  ;;  %s598_s30 = int_to_ptr.vmem [resolvable:$true] %s183_s30 }
  0x3d   : > { %vm160_vm1 = vcmp.gt.f32.partialorder %v275_v2, %v156_v3  ;;  %s603_s12 = scalar_lea.hbm %s651_s1, %s278_s2  ;;  %s169_s13 = scalar_lea.sflag [#allocation4], %s588_s26 }
  0x3e   : > { %v161_v7 = vsel %vm160_vm1, %v275_v2, %v156_v3  ;;  %v162_v8 = vsel %vm160_vm1, 2, %v157_v5  ;;  %s377_s15 = scalar_lea.vmem %s598_s30, 32  ;;  %p659_p9 = scmp.ne.s32.totalorder %s655_s19, 0 }
  0x3f   : > { %vm165_vm2 = vcmp.gt.f32.partialorder %v276_v6, %v161_v7  ;;  %p378_p8 = scmp.ne.s32.totalorder %s598_s30, %s377_s15  ;;  %s465_s9 = smov [#allocation5]  }
  0x40   : > { %v166_v9 = vsel %vm165_vm2, 3, %v162_v8  ;;  %s381_s16 = sshll.u32 %s465_s9, 4  ;;  %s382_s16 = int_to_ptr.vmem [resolvable:$false] %s381_s16 }
  0x41   : > { %167 = vst [vmem:[%s151_s29] sm:$0x3] %v166_v9  ;;  %p379_p11 = pnand %p378_p8, %p659_p9  ;;  %s383_s17 = scalar_lea.vmem %s382_s16, 64 }
  0x42   : > { %p384_p6 = scmp.lt.s32.totalorder %s598_s30, %s382_s16  ;;  %p385_p13 = scmp.lt.s32.totalorder %s383_s17, %s377_s15 }
  0x43   : > { %p380_p0 = pneg %p379_p11 }
  0x44   : > { %p386_p2 = por %p385_p13, %p384_p6 }
  0x46   : > { %p387_p5 = pnand %p386_p2, %p380_p0 }
  0x48   : > { %390 = shalt.err (!%p387_p5)
}
  0x49   : > { %s391_s22 = scalar_lea.hbm %s603_s12, 32  ;;  %s395_s25 = scalar_lea.hbm %s651_s1, 64 }
  0x4a   : > { %p392_p4 = scmp.ne.s32.totalorder %s603_s12, %s391_s22  ;;  %p396_p12 = scmp.lt.u32.totalorder %s603_s12, %s651_s1 }
  0x4b   : > { %p397_p1 = scmp.lt.u32.totalorder %s395_s25, %s391_s22  ;;  %p399_p8 = scmp.lt.u32.totalorder %s391_s22, %s603_s12 }
  0x4c   : > { %p393_p7 = pnand %p392_p4, %p659_p9 }
  0x4d   : > { %p398_p3 = por %p397_p1, %p396_p12 }
  0x4e   : > { %p394_p10 = pneg %p393_p7 }
  0x4f   : > { %p400_p11 = por %p399_p8, %p398_p3 }
  0x51   : > { %p401_p0 = pnand %p400_p11, %p394_p10 }
  0x53   : > { %404 = shalt.err (!%p401_p0)
}
  0x54   : > { %284 = dma.vmem_to_hbm [thread:$0]  (%p659_p9), %s598_s30, 32, %s603_s12, %s169_s13  }
  0x55 PF: > { %s195_s3 = sand.u32 1, %s439_s6   ;;  %p660_p6 = scmp.ne.s32.totalorder %s656_s21, 0 }
  0x56   : > { %p661_p13 = scmp.ge.s32.totalorder %s459_s11, 2  ;;  %s196_s4 = scalar_lea.sflag [#allocation4], %s195_s3 }
  0x58   : > { %p291_p2 = pnand %p661_p13, %p660_p6 }
  0x5a   : > { %434 = dma.done.wait (!%p291_p2), %s196_s4, 32  }
  0x5b   : > { %436 = vsyncadd (!%p291_p2), %s196_s4, 4294967264  ;;  %s17_s11 = sadd.s32 1, %s459_s11   ;;  %s662_s6 = smov %s443_s7 }
  0x5c   : > { %p14_p5 = scmp.ge.s32.totalorder %s17_s11, 4   ;;  %s663_s7 = smov %s447_s8 }
  0x5d   : > { %s664_s8 = smov %s532_s20  ;;  %s665_s9 = smov %s455_s10 }
  0x5e   : > { %s666_s10 = smov %s668_s14  ;;  %16 = sbr.rel (!%p14_p5) target bundleno = 6 (0x6), region = 72 }
  0x65   :  { %201 = vsyncpa [#allocation3], 1 }
  0x66   :  { %203 = vsyncpa [#allocation3 + $0x1], 1 }
  0x67   :  { %204 = vsyncpa [#allocation4], 1 }
  0x68   :  { %206 = vsyncpa [#allocation4 + $0x1], 1 }

</bundles_post_ra>
